<compile_context>
chip_gen: v7x
topology: tpu7x:2x2x1
jax: 0.10.0
libtpu: 0.0.40
codegen_flags: <defaults>
</compile_context>

<pallas_src>
import jax
import jax.numpy as jnp
from jax.experimental import pallas as pl
from jax.experimental.pallas import tpu as pltpu

TILE = 128   # node-row / node-col tile (MXU-friendly)
LANE = 128   # lane width used to pad narrow (K or output) dims

_VMEM_LIMIT = 32 * 1024 * 1024  # safe on v5e/v6e/v7x; tiles here are tiny


def _round_up(x, m):
    return (x + m - 1) // m * m


def _leaky_relu(x, negative_slope=0.01):
    return jnp.where(x > 0, x, negative_slope * x)


# --------------------------------------------------------------------------
# Kernel 1: input Linear + LeakyReLU   (row-tiled over nodes)
# --------------------------------------------------------------------------
def input_mlp_kernel(x_ref, w_ref, b_ref, o_ref):
    h = jnp.dot(x_ref[...], w_ref[...], preferred_element_type=jnp.float32)
    h = h + b_ref[...]
    o_ref[...] = _leaky_relu(h).astype(o_ref.dtype)


def input_mlp(x_bf16, w_bf16, b_f32, *, tm=TILE):
    n_pad, emb_pad = x_bf16.shape
    hdim = w_bf16.shape[1]
    flops = 2 * n_pad * emb_pad * hdim
    bytes_accessed = 2 * (n_pad * emb_pad + emb_pad * hdim + n_pad * hdim) + 4 * hdim
    return pl.pallas_call(
        input_mlp_kernel,
        out_shape=jax.ShapeDtypeStruct((n_pad, hdim), jnp.bfloat16),
        grid_spec=pltpu.PrefetchScalarGridSpec(
            num_scalar_prefetch=0,
            grid=(n_pad // tm,),
            in_specs=[
                pl.BlockSpec((tm, emb_pad), lambda i: (i, 0)),
                pl.BlockSpec((emb_pad, hdim), lambda i: (0, 0)),
                pl.BlockSpec((1, hdim), lambda i: (0, 0)),
            ],
            out_specs=pl.BlockSpec((tm, hdim), lambda i: (i, 0)),
        ),
        compiler_params=pltpu.CompilerParams(
            dimension_semantics=("parallel",),
            vmem_limit_bytes=_VMEM_LIMIT,
        ),
        cost_estimate=pl.CostEstimate(
            flops=flops, transcendentals=0, bytes_accessed=int(bytes_accessed)),
    )(x_bf16, w_bf16, b_f32)


# --------------------------------------------------------------------------
# Kernel 2: SAGEConv  (agg = A @ h, then lin_l(agg) + b_l + lin_r(h_self))
# grid = (row tiles "parallel", aggregation tiles "arbitrary")
# --------------------------------------------------------------------------
def sage_conv_kernel(adj_ref, h_nbr_ref, h_self_ref, wl_ref, wr_ref, bl_ref,
                     o_ref, agg_ref):
    k = pl.program_id(1)

    @pl.when(k == 0)
    def _():
        agg_ref[...] = jnp.zeros_like(agg_ref)

    agg_ref[...] += jnp.dot(adj_ref[...], h_nbr_ref[...],
                            preferred_element_type=jnp.float32)

    @pl.when(k == pl.num_programs(1) - 1)
    def _():
        agg = agg_ref[...].astype(jnp.bfloat16)
        out = (jnp.dot(agg, wl_ref[...], preferred_element_type=jnp.float32)
               + bl_ref[...]
               + jnp.dot(h_self_ref[...], wr_ref[...],
                         preferred_element_type=jnp.float32))
        o_ref[...] = out.astype(o_ref.dtype)


def sage_conv_layer(adj, h, wl, wr, bl, *, tm=TILE, tk=TILE):
    n_pad = adj.shape[0]
    hdim = h.shape[1]
    flops = 2 * n_pad * n_pad * hdim + 4 * n_pad * hdim * hdim
    bytes_accessed = 2 * (n_pad * n_pad + 3 * n_pad * hdim + 2 * hdim * hdim) + 4 * hdim
    return pl.pallas_call(
        sage_conv_kernel,
        out_shape=jax.ShapeDtypeStruct((n_pad, hdim), jnp.bfloat16),
        grid_spec=pltpu.PrefetchScalarGridSpec(
            num_scalar_prefetch=0,
            grid=(n_pad // tm, n_pad // tk),
            in_specs=[
                pl.BlockSpec((tm, tk), lambda i, k: (i, k)),       # A row tile
                pl.BlockSpec((tk, hdim), lambda i, k: (k, 0)),     # neighbor rows
                pl.BlockSpec((tm, hdim), lambda i, k: (i, 0)),     # self rows
                pl.BlockSpec((hdim, hdim), lambda i, k: (0, 0)),   # W_l
                pl.BlockSpec((hdim, hdim), lambda i, k: (0, 0)),   # W_r
                pl.BlockSpec((1, hdim), lambda i, k: (0, 0)),      # b_l
            ],
            out_specs=pl.BlockSpec((tm, hdim), lambda i, k: (i, 0)),
            scratch_shapes=[pltpu.VMEM((tm, hdim), jnp.float32)],
        ),
        compiler_params=pltpu.CompilerParams(
            dimension_semantics=("parallel", "arbitrary"),
            vmem_limit_bytes=_VMEM_LIMIT,
        ),
        cost_estimate=pl.CostEstimate(
            flops=flops, transcendentals=0, bytes_accessed=int(bytes_accessed)),
    )(adj, h, h, wl, wr, bl)


# --------------------------------------------------------------------------
# Kernel 3: SAGEConv2 fused with the output Linear (lane-dense 128-wide out)
# --------------------------------------------------------------------------
def sage_conv_out_kernel(adj_ref, h_nbr_ref, h_self_ref, wl_ref, wr_ref, bl_ref,
                         wo_ref, bo_ref, o_ref, agg_ref):
    k = pl.program_id(1)

    @pl.when(k == 0)
    def _():
        agg_ref[...] = jnp.zeros_like(agg_ref)

    agg_ref[...] += jnp.dot(adj_ref[...], h_nbr_ref[...],
                            preferred_element_type=jnp.float32)

    @pl.when(k == pl.num_programs(1) - 1)
    def _():
        agg = agg_ref[...].astype(jnp.bfloat16)
        h = (jnp.dot(agg, wl_ref[...], preferred_element_type=jnp.float32)
             + bl_ref[...]
             + jnp.dot(h_self_ref[...], wr_ref[...],
                       preferred_element_type=jnp.float32))
        o_ref[...] = (jnp.dot(h.astype(jnp.bfloat16), wo_ref[...],
                              preferred_element_type=jnp.float32)
                      + bo_ref[...])


def sage_conv_out_layer(adj, h, wl, wr, bl, wo, bo, *, tm=TILE, tk=TILE):
    n_pad = adj.shape[0]
    hdim = h.shape[1]
    ow = wo.shape[1]
    flops = (2 * n_pad * n_pad * hdim + 4 * n_pad * hdim * hdim
             + 2 * n_pad * hdim * ow)
    bytes_accessed = (2 * (n_pad * n_pad + 3 * n_pad * hdim + 2 * hdim * hdim
                           + hdim * ow)
                      + 4 * (hdim + ow + n_pad * ow))
    return pl.pallas_call(
        sage_conv_out_kernel,
        out_shape=jax.ShapeDtypeStruct((n_pad, ow), jnp.float32),
        grid_spec=pltpu.PrefetchScalarGridSpec(
            num_scalar_prefetch=0,
            grid=(n_pad // tm, n_pad // tk),
            in_specs=[
                pl.BlockSpec((tm, tk), lambda i, k: (i, k)),       # A row tile
                pl.BlockSpec((tk, hdim), lambda i, k: (k, 0)),     # neighbor rows
                pl.BlockSpec((tm, hdim), lambda i, k: (i, 0)),     # self rows
                pl.BlockSpec((hdim, hdim), lambda i, k: (0, 0)),   # W_l
                pl.BlockSpec((hdim, hdim), lambda i, k: (0, 0)),   # W_r
                pl.BlockSpec((1, hdim), lambda i, k: (0, 0)),      # b_l
                pl.BlockSpec((hdim, ow), lambda i, k: (0, 0)),     # W_out (padded)
                pl.BlockSpec((1, ow), lambda i, k: (0, 0)),        # b_out (padded)
            ],
            out_specs=pl.BlockSpec((tm, ow), lambda i, k: (i, 0)),
            scratch_shapes=[pltpu.VMEM((tm, hdim), jnp.float32)],
        ),
        compiler_params=pltpu.CompilerParams(
            dimension_semantics=("parallel", "arbitrary"),
            vmem_limit_bytes=_VMEM_LIMIT,
        ),
        cost_estimate=pl.CostEstimate(
            flops=flops, transcendentals=0, bytes_accessed=int(bytes_accessed)),
    )(adj, h, h, wl, wr, bl, wo, bo)


# --------------------------------------------------------------------------
# Host-side helpers / wrapper
# --------------------------------------------------------------------------
def build_norm_adjacency(edge_index, num_nodes):
    """A[i, j] = 1/deg_in(i) if edge j->i exists (edge_index[0]=src, [1]=dst)."""
    src = edge_index[0]
    dst = edge_index[1]
    adj = jnp.zeros((num_nodes, num_nodes), jnp.float32).at[dst, src].add(1.0)
    deg = jnp.maximum(adj.sum(axis=1, keepdims=True), 1.0)
    return adj / deg


def sage_forward(feature, edge_index, edge_type, params):
    # edge_type accepted for signature parity; unused in the PyTorch forward too.
    del edge_type
    n, emb = feature.shape
    hdim = params["w_in"].shape[1]
    out_dim = params["w_out"].shape[1]

    n_pad = _round_up(n, TILE)
    emb_pad = _round_up(emb, LANE)
    out_pad = _round_up(out_dim, LANE)

    # Dense, row-normalized mean-aggregation matrix, built at padded size.
    # Padded rows/cols are zero (deg clamp -> 1), so real nodes are unaffected.
    adj = build_norm_adjacency(edge_index, n_pad).astype(jnp.bfloat16)

    feat = jnp.zeros((n_pad, emb_pad), jnp.bfloat16).at[:n, :emb].set(
        feature.astype(jnp.bfloat16))

    w_in = jnp.zeros((emb_pad, hdim), jnp.bfloat16).at[:emb, :].set(
        params["w_in"].astype(jnp.bfloat16))
    b_in = params["b_in"].astype(jnp.float32)

    wl1 = params["wl1"].astype(jnp.bfloat16)
    wr1 = params["wr1"].astype(jnp.bfloat16)
    bl1 = params["bl1"].astype(jnp.float32)
    wl2 = params["wl2"].astype(jnp.bfloat16)
    wr2 = params["wr2"].astype(jnp.bfloat16)
    bl2 = params["bl2"].astype(jnp.float32)

    # Lane-dense output head: pad (H, 3) -> (H, 128), slice after the call.
    w_out = jnp.zeros((hdim, out_pad), jnp.bfloat16).at[:, :out_dim].set(
        params["w_out"].astype(jnp.bfloat16))
    b_out = jnp.zeros((1, out_pad), jnp.float32).at[:, :out_dim].set(
        params["b_out"].astype(jnp.float32))

    h = input_mlp(feat, w_in, b_in)                                  # (n_pad, H)
    h = sage_conv_layer(adj, h, wl1, wr1, bl1)                       # (n_pad, H)
    # dropout: identity in eval / inference mode
    out = sage_conv_out_layer(adj, h, wl2, wr2, bl2, w_out, b_out)   # (n_pad, 128)
    return out[:n, :out_dim]


def init_params(key, embedding_dimension=16, hidden_dimension=128, out_dim=3):
    ks = jax.random.split(key, 12)
    scale = 0.1

    def w(k, shape):
        return (scale * jax.random.normal(k, shape)).astype(jnp.float32)

    return {
        # input MLP
        "w_in": w(ks[0], (embedding_dimension, hidden_dimension)),
        "b_in": w(ks[1], (1, hidden_dimension)),
        # SAGEConv 1 (lin_l has bias, lin_r does not)
        "wl1": w(ks[2], (hidden_dimension, hidden_dimension)),
        "wr1": w(ks[3], (hidden_dimension, hidden_dimension)),
        "bl1": w(ks[4], (1, hidden_dimension)),
        # SAGEConv 2
        "wl2": w(ks[5], (hidden_dimension, hidden_dimension)),
        "wr2": w(ks[6], (hidden_dimension, hidden_dimension)),
        "bl2": w(ks[7], (1, hidden_dimension)),
        # output linear
        "w_out": w(ks[8], (hidden_dimension, out_dim)),
        "b_out": w(ks[9], (1, out_dim)),
    }


if __name__ == "__main__":
    key = jax.random.PRNGKey(0)
    k_feat, k_edge, k_type, k_param = jax.random.split(key, 4)

    N = 16            # nodes
    E = 40            # edges
    EMB = 16          # embedding_dimension
    HID = 128         # hidden_dimension
    OUT = 3           # out_dim

    feature = jax.random.normal(k_feat, (N, EMB), dtype=jnp.float32)
    edge_index = jax.random.randint(k_edge, (2, E), 0, N, dtype=jnp.int32)
    edge_type = jax.random.randint(k_type, (E,), 0, 2, dtype=jnp.int32)

    params = init_params(k_param, EMB, HID, OUT)

    out = sage_forward(feature, edge_index, edge_type, params)
    out = jax.block_until_ready(out)
    assert out.shape == (N, OUT), out.shape

    # Plain-JAX f32 reference of the same math (kernel runs bf16 matmuls with
    # f32 accumulation, so compare with a bf16-level tolerance).
    adj = build_norm_adjacency(edge_index, N)
    z = feature @ params["w_in"] + params["b_in"]
    h = jnp.where(z > 0, z, 0.01 * z)
    h = (adj @ h) @ params["wl1"] + params["bl1"] + h @ params["wr1"]
    h = (adj @ h) @ params["wl2"] + params["bl2"] + h @ params["wr2"]
    ref = h @ params["w_out"] + params["b_out"]
    assert jnp.allclose(out, ref, atol=3e-2, rtol=3e-2), float(
        jnp.max(jnp.abs(out - ref)))

    print("KERNEL_OK")
</pallas_src>

<mosaic_0001>
module attributes {stable_mosaic.version = 11 : i64} {
  func.func @input_mlp_kernel(%arg0: i32, %arg1: memref<128x128xbf16, #tpu.memory_space<vmem>>, %arg2: memref<128x128xbf16, #tpu.memory_space<vmem>>, %arg3: memref<1x128xf32, #tpu.memory_space<vmem>>, %arg4: memref<128x128xbf16, #tpu.memory_space<vmem>>) attributes {dimension_semantics = [#tpu.dimension_semantics<parallel>], iteration_bounds = array<i64: 1>, scalar_prefetch = 0 : i64, scratch_operands = 0 : i64, tpu.core_type = #tpu.core_type<tc>, window_params = [{transform_indices = @transform_0, window_bounds = array<i64: 128, 128>}, {pipeline_mode = #tpu.pipeline_mode<synchronous>, transform_indices = @transform_1, window_bounds = array<i64: 128, 128>}, {pipeline_mode = #tpu.pipeline_mode<synchronous>, transform_indices = @transform_2, window_bounds = array<i64: 1, 128>}, {transform_indices = @transform_3, window_bounds = array<i64: 128, 128>}]} {
    %c0 = arith.constant 0 : index
    %c0_0 = arith.constant 0 : index
    %0 = vector.load %arg1[%c0, %c0_0] : memref<128x128xbf16, #tpu.memory_space<vmem>>, vector<128x128xbf16>
    %c0_1 = arith.constant 0 : index
    %c0_2 = arith.constant 0 : index
    %1 = vector.load %arg2[%c0_1, %c0_2] : memref<128x128xbf16, #tpu.memory_space<vmem>>, vector<128x128xbf16>
    %cst = arith.constant dense<0.000000e+00> : vector<128x128xf32>
    %2 = tpu.matmul %0, %1, %cst {dimension_numbers = #tpu.dot_dimension_numbers<[1], [0], [0], [1], [0, 0, 1, 1], [], []>} : vector<128x128xbf16>, vector<128x128xbf16>, vector<128x128xf32> -> vector<128x128xf32>
    %c0_3 = arith.constant 0 : index
    %c0_4 = arith.constant 0 : index
    %3 = vector.load %arg3[%c0_3, %c0_4] : memref<1x128xf32, #tpu.memory_space<vmem>>, vector<1x128xf32>
    %4 = vector.broadcast %3 : vector<1x128xf32> to vector<128x128xf32>
    %5 = arith.addf %2, %4 : vector<128x128xf32>
    %cst_5 = arith.constant 0.000000e+00 : f32
    %6 = vector.broadcast %cst_5 : f32 to vector<128x128xf32>
    %7 = arith.cmpf ogt, %5, %6 : vector<128x128xf32>
    %cst_6 = arith.constant 0.00999999977 : f32
    %8 = vector.broadcast %cst_6 : f32 to vector<128x128xf32>
    %9 = arith.mulf %8, %5 : vector<128x128xf32>
    %10 = arith.select %7, %5, %9 : vector<128x128xi1>, vector<128x128xf32>
    %11 = arith.truncf %10 : vector<128x128xf32> to vector<128x128xbf16>
    %c0_7 = arith.constant 0 : index
    %c0_8 = arith.constant 0 : index
    %12 = vector.load %arg4[%c0_7, %c0_8] : memref<128x128xbf16, #tpu.memory_space<vmem>>, vector<128x128xbf16>
    tpu.vector_store %arg4[%c0_7, %c0_8], %11 {strides = array<i32>} : memref<128x128xbf16, #tpu.memory_space<vmem>>, vector<128x128xbf16>,
    return
  }
  func.func @transform_0(%arg0: i32) -> (i32, i32) {
    %c0_i32 = arith.constant 0 : i32
    %c0_i32_0 = arith.constant 0 : i32
    return %arg0, %c0_i32 : i32, i32
  }
  func.func @transform_1(%arg0: i32) -> (i32, i32) {
    %c0_i32 = arith.constant 0 : i32
    %c0_i32_0 = arith.constant 0 : i32
    %c0_i32_1 = arith.constant 0 : i32
    return %c0_i32, %c0_i32_0 : i32, i32
  }
  func.func @transform_2(%arg0: i32) -> (i32, i32) {
    %c0_i32 = arith.constant 0 : i32
    %c0_i32_0 = arith.constant 0 : i32
    %c0_i32_1 = arith.constant 0 : i32
    return %c0_i32, %c0_i32_0 : i32, i32
  }
  func.func @transform_3(%arg0: i32) -> (i32, i32) {
    %c0_i32 = arith.constant 0 : i32
    %c0_i32_0 = arith.constant 0 : i32
    return %arg0, %c0_i32 : i32, i32
  }
}

</mosaic_0001>

<bundles_post_ra>
// kernel: tpu_custom_call.1
= control target key start
LH: loop header
LB: loop body
LE: loop exit
PB: predicated region body
PF: predicated region fallthrough
CT: control target
= control target key end

     0   :  { %8 = vsyncpa [#allocation3], 0  ;;  %s770_s0 = inlined_call_operand.hbm [shape: bf16[128,128], index: 0, kind: input, shape index: {}]   ;;  %s771_s1 = inlined_call_operand.hbm [shape: bf16[128,128], index: 1, kind: input, shape index: {}]   ;;  %s772_s2 = inlined_call_operand.vmem [shape: f32[1,128], index: 2, kind: input, shape index: {}]   ;;  %s773_s3 = inlined_call_operand.hbm [shape: bf16[128,128], index: 3, kind: output, shape index: {}]  }
   0x1   :  { %9 = vsyncpa [#allocation6], 0 }
   0x2   :  { %10 = vsyncpa [#allocation4], 0  ;;  %s675_s12 = smov [#allocation2]   ;;  %s603_s16 = scalar_lea.hbm %s770_s0, 1024 }
   0x3   :  { %s16_s13 = sshll.u32 %s675_s12, 4  ;;  %p604_p0 = scmp.ne.s32.totalorder %s770_s0, %s603_s16  ;;  %s17_s13 = int_to_ptr.vmem [resolvable:$true] %s16_s13 }
   0x4   :  { %p607_p1 = scmp.lt.u32.totalorder %s603_s16, %s770_s0 }
   0x6   :  { %p609_p2 = pnand %p607_p1, %p604_p0 }
   0x8   :  { %612 = shalt.err (!%p609_p2)
}
   0x9   :  { %s613_s21 = scalar_lea.vmem %s17_s13, 1024  ;;  %p618_p4 = scmp.lt.s32.totalorder %s17_s13, %s17_s13 }
   0xa   :  { %p614_p3 = scmp.ne.s32.totalorder %s17_s13, %s613_s21  ;;  %p619_p5 = scmp.lt.s32.totalorder %s613_s21, %s613_s21 }
   0xc   :  { %p620_p6 = por %p619_p5, %p618_p4 }
   0xe   :  { %p621_p7 = pnand %p620_p6, %p614_p3 }
  0x10   :  { %624 = shalt.err (!%p621_p7)
}
  0x11   :  { %s676_s22 = smov 64   ;;  %s677_s23 = smov 4  }
  0x12   :  { %22 = dma.hbm_to_vmem [thread:$0]  %s770_s0, 1024, %s17_s13, [#allocation3], %s676_s22, %s676_s22, %s677_s23  }
  0x13   :  { %s678_s26 = smov [#allocation5]   ;;  %s625_s30 = scalar_lea.hbm %s771_s1, 1024 }
  0x14   :  { %s28_s27 = sshll.u32 %s678_s26, 4  ;;  %p626_p8 = scmp.ne.s32.totalorder %s771_s1, %s625_s30  ;;  %s29_s27 = int_to_ptr.vmem [resolvable:$true] %s28_s27 }
  0x15   :  { %p629_p9 = scmp.lt.u32.totalorder %s625_s30, %s771_s1 }
  0x17   :  { %p631_p10 = pnand %p629_p9, %p626_p8 }
  0x19   :  { %634 = shalt.err (!%p631_p10)
}
  0x1a   :  { %s635_s8 = scalar_lea.vmem %s29_s27, 1024  ;;  %p640_p12 = scmp.lt.s32.totalorder %s29_s27, %s29_s27 }
  0x1b   :  { %p636_p11 = scmp.ne.s32.totalorder %s29_s27, %s635_s8  ;;  %p641_p13 = scmp.lt.s32.totalorder %s635_s8, %s635_s8 }
  0x1d   :  { %p642_p0 = por %p641_p13, %p640_p12 }
  0x1f   :  { %p643_p1 = pnand %p642_p0, %p636_p11 }
  0x21   :  { %646 = shalt.err (!%p643_p1)
}
  0x22   :  { %34 = dma.hbm_to_vmem [thread:$0]  %s771_s1, 1024, %s29_s27, [#allocation6], %s676_s22, %s676_s22, %s677_s23  }
  0x23   :  { %669 = dma.done.wait [#allocation3], 1024  }
  0x24   :  { %670 = vsyncadd [#allocation3], 4294966272 }
  0x25   :  { %671 = dma.done.wait [#allocation6], 1024  }
  0x26   :  { %672 = vsyncadd [#allocation6], 4294966272  ;;  %v587_v0 = vld [vmem:[#allocation5] sm:$0xff]   ;;  %v588_v1 = vld [vmem:[#allocation5 + $0x8] sm:$0xff]  }
  0x27   :  { %534 = vmatprep.subr.bf16.mxu0 %v587_v0  ;;  %566 = vmatprep.subr.bf16.mxu1 %v587_v0  ;;  %v589_v2 = vld [vmem:[#allocation5 + $0x10] sm:$0xff]   ;;  %v590_v3 = vld [vmem:[#allocation5 + $0x18] sm:$0xff]   ;;  %v595_v4 = vld [vmem:[#allocation2] sm:$0xff]  }
  0x28   :  { %535 = vmatpush3.bf16.msra.mxu0 %v587_v0  ;;  %574 = vmatpush3.bf16.msra.mxu1 %v587_v0  ;;  %v596_v5 = vld [vmem:[#allocation2 + $0x20] sm:$0xff]   ;;  %v592_v7 = vld [vmem:[#allocation5 + $0x28] sm:$0xff]   ;;  %v593_v8 = vld [vmem:[#allocation5 + $0x30] sm:$0xff]  }
  0x29   :  { %536 = vmatprep.subr.bf16.mxu0 %v588_v1  ;;  %567 = vmatprep.subr.bf16.mxu1 %v588_v1  ;;  %v591_v6 = vld [vmem:[#allocation5 + $0x20] sm:$0xff]   ;;  %v594_v9 = vld [vmem:[#allocation5 + $0x38] sm:$0xff]   ;;  %v597_v10 = vld [vmem:[#allocation2 + $0x8] sm:$0xff]  }
  0x2a   :  { %550 = vmatprep.mubr.bf16.mxu0 %v595_v4  ;;  %558 = vmatprep.mubr.bf16.mxu1 %v596_v5  ;;  %v598_v11 = vld [vmem:[#allocation2 + $0x28] sm:$0xff]   ;;  %v599_v12 = vld [vmem:[#allocation2 + $0x10] sm:$0xff]   ;;  %v601_v14 = vld [vmem:[#allocation2 + $0x18] sm:$0xff]  }
  0x2b   :  { %v600_v13 = vld [vmem:[#allocation2 + $0x30] sm:$0xff]   ;;  %v602_v15 = vld [vmem:[#allocation2 + $0x38] sm:$0xff]   ;;  %v733_v16 = vld [vmem:[%s772_s2] ss:$0 sm:$0xff]  ;;  %s679_s2 = smov [#allocation7]  }
  0x2c   :  { %537 = vmatpush3.bf16.msra.mxu0 %v588_v1  ;;  %575 = vmatpush3.bf16.msra.mxu1 %v588_v1  ;;  %s409_s11 = sshll.u32 %s679_s2, 4  ;;  %s410_s11 = int_to_ptr.vmem [resolvable:$true] %s409_s11 }
  0x2d   :  { %538 = vmatprep.subr.bf16.mxu0 %v589_v2  ;;  %568 = vmatprep.subr.bf16.mxu1 %v589_v2  ;;  %s647_s12 = scalar_lea.vmem %s410_s11, 1024  ;;  %p652_p3 = scmp.lt.s32.totalorder %s410_s11, %s410_s11 }
  0x2e   :  { %p648_p2 = scmp.ne.s32.totalorder %s410_s11, %s647_s12  ;;  %p653_p4 = scmp.lt.s32.totalorder %s647_s12, %s647_s12 }
  0x30   :  { %539 = vmatpush3.bf16.msra.mxu0 %v589_v2  ;;  %576 = vmatpush3.bf16.msra.mxu1 %v589_v2  ;;  %p654_p5 = por %p653_p4, %p652_p3 }
  0x31   :  { %540 = vmatprep.subr.bf16.mxu0 %v590_v3  ;;  %569 = vmatprep.subr.bf16.mxu1 %v590_v3 }
  0x32   :  { %p655_p6 = pnand %p654_p5, %p648_p2 }
  0x34   :  { %541 = vmatpush3.bf16.msra.mxu0 %v590_v3  ;;  %577 = vmatpush3.bf16.msra.mxu1 %v590_v3 }
  0x35   :  { %542 = vmatprep.subr.bf16.mxu0 %v591_v6  ;;  %570 = vmatprep.subr.bf16.mxu1 %v591_v6 }
  0x38   :  { %543 = vmatpush3.bf16.msra.mxu0 %v591_v6  ;;  %578 = vmatpush3.bf16.msra.mxu1 %v591_v6 }
  0x39   :  { %544 = vmatprep.subr.bf16.mxu0 %v592_v7  ;;  %571 = vmatprep.subr.bf16.mxu1 %v592_v7 }
  0x3c   :  { %545 = vmatpush3.bf16.msra.mxu0 %v592_v7  ;;  %579 = vmatpush3.bf16.msra.mxu1 %v592_v7 }
  0x3d   :  { %546 = vmatprep.subr.bf16.mxu0 %v593_v8  ;;  %572 = vmatprep.subr.bf16.mxu1 %v593_v8 }
  0x40   :  { %547 = vmatpush3.bf16.msra.mxu0 %v593_v8  ;;  %580 = vmatpush3.bf16.msra.mxu1 %v593_v8 }
  0x41   :  { %548 = vmatprep.subr.bf16.mxu0 %v594_v9  ;;  %573 = vmatprep.subr.bf16.mxu1 %v594_v9 }
  0x44   :  { %549 = vmatpush3.bf16.msra.mxu0 %v594_v9  ;;  %581 = vmatpush3.bf16.msra.mxu1 %v594_v9 }
  0x47   :  { %551 = vmatmul.mubr.bf16.vlgmr.msra.gmra.mrb[0].mxu0 %v597_v10  ;;  %559 = vmatmul.mubr.bf16.vlgmr.msra.gmra.mrb[0].mxu1 %v598_v11 }
  0x48   :  { %554 = vmatprep.mubr.bf16.mxu0 %v599_v12  ;;  %562 = vmatprep.mubr.bf16.mxu1 %v600_v13 }
  0x4f   :  { %555 = vmatmul.mubr.bf16.gmra.mrb[4].mxu0 %v601_v14  ;;  %563 = vmatmul.mubr.bf16.gmra.mrb[4].mxu1 %v602_v15 }
 0x11a   :  { %v552_v17 = vpop.f32.mrb[0].mxu0  ;;  %v560_v18 = vpop.f32.mrb[0].mxu1 }
 0x11b   :  { %v222_v19 = vadd.f32 %v552_v17, %v733_v16  ;;  %v254_v20 = vadd.f32 %v560_v18, %v733_v16  ;;  %v213_v21 = vpop.f32.mrb[1].mxu0  ;;  %v245_v22 = vpop.f32.mrb[1].mxu1 }
 0x11c   :  { %v214_v23 = vadd.f32 %v733_v16, %v213_v21  ;;  %v246_v24 = vadd.f32 %v733_v16, %v245_v22  ;;  %v553_v25 = vpop.f32.mrb[2].mxu0  ;;  %v561_v26 = vpop.f32.mrb[2].mxu1 }
 0x11d   :  { %vm278_vm0 = vcmp.gt.f32.partialorder %v222_v19, 0.0  ;;  %v294_v27 = vmul.f32 0.01, %v222_v19  ;;  %vm286_vm1 = vcmp.gt.f32.partialorder %v254_v20, 0.0  ;;  %v302_v28 = vmul.f32 0.01, %v254_v20 }
 0x11e   :  { %vm276_vm2 = vcmp.gt.f32.partialorder %v214_v23, 0.0  ;;  %v292_v29 = vmul.f32 0.01, %v214_v23  ;;  %vm284_vm3 = vcmp.gt.f32.partialorder %v246_v24, 0.0  ;;  %v300_v30 = vmul.f32 0.01, %v246_v24 }
 0x11f   :  { %v225_v31 = vadd.f32 %v553_v25, %v733_v16  ;;  %v257_v32 = vadd.f32 %v561_v26, %v733_v16  ;;  %v216_v33 = vpop.f32.mrb[3].mxu0  ;;  %v248_v34 = vpop.f32.mrb[3].mxu1  ;;  %v310_v35 = vsel %vm278_vm0, %v222_v19, %v294_v27  ;;  %v318_v36 = vsel %vm286_vm1, %v254_v20, %v302_v28 }
 0x120   :  { %v217_v37 = vadd.f32 %v733_v16, %v216_v33  ;;  %v249_v38 = vadd.f32 %v733_v16, %v248_v34  ;;  %v308_v43 = vsel %vm276_vm2, %v214_v23, %v292_v29  ;;  %v316_v44 = vsel %vm284_vm3, %v246_v24, %v300_v30 }
 0x121   :  { %vm279_vm4 = vcmp.gt.f32.partialorder %v225_v31, 0.0  ;;  %v295_v39 = vmul.f32 0.01, %v225_v31  ;;  %vm287_vm5 = vcmp.gt.f32.partialorder %v257_v32, 0.0  ;;  %v303_v40 = vmul.f32 0.01, %v257_v32 }
 0x122   :  { %vm277_vm6 = vcmp.gt.f32.partialorder %v217_v37, 0.0  ;;  %v293_v41 = vmul.f32 0.01, %v217_v37  ;;  %vm285_vm7 = vcmp.gt.f32.partialorder %v249_v38, 0.0  ;;  %v301_v42 = vmul.f32 0.01, %v249_v38 }
 0x123   :  { %v311_v45 = vsel %vm279_vm4, %v225_v31, %v295_v39  ;;  %v319_v46 = vsel %vm287_vm5, %v257_v32, %v303_v40  ;;  %v556_v47 = vpop.f32.mrb[4].mxu0  ;;  %v564_v48 = vpop.f32.mrb[4].mxu1 }
 0x124   :  { %v479_v49 = vpack.c.bf16 %v311_v45, %v310_v35  ;;  %v499_v50 = vpack.c.bf16 %v319_v46, %v318_v36  ;;  %v309_v51 = vsel %vm277_vm6, %v217_v37, %v293_v41  ;;  %v317_v52 = vsel %vm285_vm7, %v249_v38, %v301_v42  ;;  %v229_v53 = vpop.f32.mrb[5].mxu0  ;;  %v261_v54 = vpop.f32.mrb[5].mxu1 }
 0x125   :  { %v474_v55 = vpack.c.bf16 %v309_v51, %v308_v43  ;;  %v494_v56 = vpack.c.bf16 %v317_v52, %v316_v44  ;;  %v238_v57 = vadd.f32 %v556_v47, %v733_v16  ;;  %v270_v58 = vadd.f32 %v564_v48, %v733_v16  ;;  %v557_v59 = vpop.f32.mrb[6].mxu0  ;;  %v565_v60 = vpop.f32.mrb[6].mxu1 }
 0x126   :  { %511 = vst [vmem:[#allocation7 + $0x8] sm:$0xff] %v479_v49   ;;  %515 = vst [vmem:[#allocation7 + $0x28] sm:$0xff] %v499_v50   ;;  %v230_v61 = vadd.f32 %v733_v16, %v229_v53  ;;  %v262_v62 = vadd.f32 %v733_v16, %v261_v54  ;;  %v241_v63 = vadd.f32 %v557_v59, %v733_v16  ;;  %v232_v1 = vpop.f32.mrb[7].mxu0  ;;  %v264_v2 = vpop.f32.mrb[7].mxu1 }
 0x127   :  { %v273_v0 = vadd.f32 %v565_v60, %v733_v16  ;;  %475 = vst [vmem:[#allocation7] sm:$0xff] %v474_v55   ;;  %514 = vst [vmem:[#allocation7 + $0x20] sm:$0xff] %v494_v56   ;;  %v298_v3 = vmul.f32 0.01, %v238_v57  ;;  %vm282_vm8 = vcmp.gt.f32.partialorder %v238_v57, 0.0  ;;  %vm290_vm9 = vcmp.gt.f32.partialorder %v270_v58, 0.0 }
 0x128   :  { %v306_v4 = vmul.f32 0.01, %v270_v58  ;;  %vm280_vm10 = vcmp.gt.f32.partialorder %v230_v61, 0.0  ;;  %vm283_vm11 = vcmp.gt.f32.partialorder %v241_v63, 0.0  ;;  %v299_v5 = vmul.f32 0.01, %v241_v63 }
 0x129   :  { %v296_v6 = vmul.f32 0.01, %v230_v61  ;;  %vm288_vm12 = vcmp.gt.f32.partialorder %v262_v62, 0.0  ;;  %vm291_vm13 = vcmp.gt.f32.partialorder %v273_v0, 0.0  ;;  %v307_v7 = vmul.f32 0.01, %v273_v0 }
 0x12a   :  { %v314_v8 = vsel %vm282_vm8, %v238_v57, %v298_v3  ;;  %v315_v9 = vsel %vm283_vm11, %v241_v63, %v299_v5  ;;  %v233_v10 = vadd.f32 %v733_v16, %v232_v1  ;;  %v265_v11 = vadd.f32 %v733_v16, %v264_v2 }
 0x12b   :  { %v322_v12 = vsel %vm290_vm9, %v270_v58, %v306_v4  ;;  %v304_v13 = vmul.f32 0.01, %v262_v62  ;;  %v489_v14 = vpack.c.bf16 %v315_v9, %v314_v8  ;;  %v323_v15 = vsel %vm291_vm13, %v273_v0, %v307_v7 }
 0x12c   :  { %v509_v17 = vpack.c.bf16 %v323_v15, %v322_v12  ;;  %vm281_vm14 = vcmp.gt.f32.partialorder %v233_v10, 0.0  ;;  %v297_v18 = vmul.f32 0.01, %v233_v10  ;;  %vm289_vm15 = vcmp.gt.f32.partialorder %v265_v11, 0.0 }
 0x12d   :  { %513 = vst [vmem:[#allocation7 + $0x18] sm:$0xff] %v489_v14   ;;  %v305_v19 = vmul.f32 0.01, %v265_v11  ;;  %v312_v20 = vsel %vm280_vm10, %v230_v61, %v296_v6  ;;  %v320_v22 = vsel %vm288_vm12, %v262_v62, %v304_v13 }
 0x12e   :  { %517 = vst [vmem:[#allocation7 + $0x38] sm:$0xff] %v509_v17   ;;  %v313_v21 = vsel %vm281_vm14, %v233_v10, %v297_v18 }
 0x12f   :  { %v484_v23 = vpack.c.bf16 %v313_v21, %v312_v20  ;;  %v321_v16 = vsel %vm289_vm15, %v265_v11, %v305_v19 }
 0x130   :  { %v504_v24 = vpack.c.bf16 %v321_v16, %v320_v22 }
 0x131   :  { %512 = vst [vmem:[#allocation7 + $0x10] sm:$0xff] %v484_v23  }
 0x132   :  { %516 = vst [vmem:[#allocation7 + $0x30] sm:$0xff] %v504_v24  }
 0x133   :  { %658 = shalt.err (!%p655_p6)
}
 0x134   :  { %s659_s15 = scalar_lea.hbm %s773_s3, 1024 }
 0x135   :  { %p660_p7 = scmp.ne.s32.totalorder %s773_s3, %s659_s15  ;;  %p663_p8 = scmp.lt.u32.totalorder %s659_s15, %s773_s3 }
 0x137   :  { %p665_p9 = pnand %p663_p8, %p660_p7 }
 0x139   :  { %668 = shalt.err (!%p665_p9)
}
 0x13a   :  { %415 = dma.vmem_to_hbm [thread:$0]  %s410_s11, 1024, %s773_s3, [#allocation4], %s676_s22, %s676_s22, %s677_s23  }
 0x13b   :  { %673 = dma.done.wait [#allocation4], 1024  }
 0x13c   :  { %674 = vsyncadd [#allocation4], 4294966272 }
 0x13d   :  { %419 = vsyncpa [#allocation3], 1 }
 0x13e   :  { %420 = vsyncpa [#allocation6], 1 }
 0x13f   :  { %421 = vsyncpa [#allocation4], 1 }

</bundles_post_ra>
